<compile_context>
chip_gen: v6e
topology: v6e:2x2x1
jax: 0.10.0
libtpu: 0.0.40
codegen_flags: <defaults>
</compile_context>

<pallas_src>
import functools
import math

import jax
import jax.numpy as jnp
import numpy as np
from jax.experimental import pallas as pl
from jax.experimental.pallas import tpu as pltpu


# ---------------------------------------------------------------------------
# Kernel (one batch element per grid step)
# ---------------------------------------------------------------------------
def _transformer_kernel(
    x_ref,          # (N, D)          input block (batch dim squeezed)
    ln1_w_ref,      # (1, D)          attn_norm weight        (f32)
    ln1_b_ref,      # (1, D)          attn_norm bias          (f32)
    wqkv_h_ref,     # (3*nh, D, hd)   [0:nh]=Wq, [nh:2nh]=Wk, [2nh:3nh]=Wv
    wo_h_ref,       # (nh, hd, D)     out_fc weight split per head
    bo_ref,         # (1, D)          out_fc bias             (f32)
    ln2_w_ref,      # (1, D)          ff_norm weight          (f32)
    ln2_b_ref,      # (1, D)          ff_norm bias            (f32)
    w1_ref,         # (D, H_ff)       ff.fc1 weight
    b1_ref,         # (1, H_ff)       ff.fc1 bias             (f32)
    w2_ref,         # (H_ff, D)       ff.fc2 weight
    b2_ref,         # (1, D)          ff.fc2 bias              (f32)
    o_ref,          # (N, D)          output block
    *,
    n_heads: int,
    head_dim: int,
    compute_dtype,
):
    eps = 1e-6
    f32 = jnp.float32
    cd = jnp.dtype(compute_dtype)
    exact = cd == jnp.dtype(jnp.float32)
    scale = 1.0 / math.sqrt(head_dim)

    x = x_ref[...].astype(f32)                                # (N, D)
    residue = x

    # ---- attn_norm (LayerNorm, biased variance, f32) -----------------------
    mu = jnp.mean(x, axis=-1, keepdims=True)
    var = jnp.mean(jnp.square(x - mu), axis=-1, keepdims=True)
    xn = (x - mu) * jax.lax.rsqrt(var + eps)
    xn = xn * ln1_w_ref[...] + ln1_b_ref[...]                  # (N, D) f32
    xn_c = xn.astype(cd)                                       # MXU operand

    # ---- multi-head self-attention ('qk' mode) ------------------------------
    # Per-head weights -> no sub-128-lane slicing of activations, no concat.
    attn_acc = None
    for h in range(n_heads):                                   # static, nh small
        qh = jnp.dot(xn_c, wqkv_h_ref[h], preferred_element_type=cd)
        kh = jnp.dot(xn_c, wqkv_h_ref[n_heads + h], preferred_element_type=cd)
        vh = jnp.dot(xn_c, wqkv_h_ref[2 * n_heads + h], preferred_element_type=cd)

        # scores: q @ k^T via dot_general (no materialized transpose)
        s = jax.lax.dot_general(
            qh, kh, (((1,), (1,)), ((), ())),
            preferred_element_type=f32) * scale                # (N, N) f32
        s = s - jnp.max(s, axis=-1, keepdims=True)
        p = jnp.exp(s)
        denom = jnp.sum(p, axis=-1, keepdims=True)
        p = p * pl.reciprocal(denom, approx=not exact)         # EUP in fast path

        oh = jnp.dot(p.astype(cd), vh, preferred_element_type=cd)       # (N, hd)
        contrib = jnp.dot(oh, wo_h_ref[h], preferred_element_type=f32)  # (N, D)
        attn_acc = contrib if attn_acc is None else attn_acc + contrib

    x = attn_acc + bo_ref[...] + residue                       # residual 1 (f32)

    # ---- ff_norm + FeedForward + residual -----------------------------------
    residue = x
    mu = jnp.mean(x, axis=-1, keepdims=True)
    var = jnp.mean(jnp.square(x - mu), axis=-1, keepdims=True)
    xn2 = (x - mu) * jax.lax.rsqrt(var + eps)
    xn2 = xn2 * ln2_w_ref[...] + ln2_b_ref[...]

    h1 = jnp.dot(xn2.astype(cd), w1_ref[...], preferred_element_type=f32)
    h1 = jnp.maximum(h1 + b1_ref[...], 0.0)                    # ReLU, f32
    ff = jnp.dot(h1.astype(cd), w2_ref[...], preferred_element_type=f32)
    ff = ff + b2_ref[...]

    o_ref[...] = (ff + residue).astype(o_ref.dtype)


# ---------------------------------------------------------------------------
# Wrapper
# ---------------------------------------------------------------------------
def transformer_forward(x, params, *, n_heads, compute_dtype=jnp.bfloat16):
    """x: (B, N, D) float32.  Returns (out, None) like the PyTorch module.

    compute_dtype: dtype of the MXU operands (weights + activation casts).
    Default bfloat16 (review recommendation for v5e/v6e/v7x); pass
    jnp.float32 for exact f32 semantics.
    """
    B, N, D = x.shape
    assert D % n_heads == 0
    hd = D // n_heads
    Hff = params["w1"].shape[1]
    cd = jnp.dtype(compute_dtype)
    f32 = jnp.float32

    # --- pack per-head weights (wrapper-side, free at XLA level) ------------
    # q/k/v heads: w[:, h*hd:(h+1)*hd]  ->  (nh, D, hd)
    wq3 = params["wq"].reshape(D, n_heads, hd).transpose(1, 0, 2)
    wk3 = params["wk"].reshape(D, n_heads, hd).transpose(1, 0, 2)
    wv3 = params["wv"].reshape(D, n_heads, hd).transpose(1, 0, 2)
    wqkv_heads = jnp.concatenate([wq3, wk3, wv3], axis=0).astype(cd)  # (3nh,D,hd)
    # Wo split per head along its input rows: (nh, hd, D)
    wo_heads = params["wo"].reshape(n_heads, hd, D).astype(cd)

    param_list = [
        params["ln1_w"].astype(f32),
        params["ln1_b"].astype(f32),
        wqkv_heads,
        wo_heads,
        params["bo"].astype(f32),
        params["ln2_w"].astype(f32),
        params["ln2_b"].astype(f32),
        params["w1"].astype(cd),
        params["b1"].astype(f32),
        params["w2"].astype(cd),
        params["b2"].astype(f32),
    ]

    def full_spec(shape):
        nd = len(shape)
        return pl.BlockSpec(shape, lambda b, _nd=nd: (0,) * _nd)

    in_specs = [pl.BlockSpec((None, N, D), lambda b: (b, 0, 0))]
    in_specs += [full_spec(tuple(p.shape)) for p in param_list]
    out_specs = pl.BlockSpec((None, N, D), lambda b: (b, 0, 0))

    kernel = functools.partial(
        _transformer_kernel, n_heads=n_heads, head_dim=hd, compute_dtype=cd
    )

    # --- advisory cost estimate ---------------------------------------------
    flops_per_b = 8 * N * D * D + 4 * N * N * D + 4 * N * D * Hff
    transcend = B * (n_heads * N * N + n_heads * N + 2 * N)
    bytes_acc = int(x.size * x.dtype.itemsize) + int(B * N * D * 4)
    bytes_acc += sum(int(np.prod(p.shape)) * p.dtype.itemsize for p in param_list)
    cost = pl.CostEstimate(
        flops=int(B * flops_per_b),
        transcendentals=int(transcend),
        bytes_accessed=int(bytes_acc),
    )

    out = pl.pallas_call(
        kernel,
        out_shape=jax.ShapeDtypeStruct((B, N, D), x.dtype),
        grid_spec=pltpu.PrefetchScalarGridSpec(
            num_scalar_prefetch=0,
            grid=(B,),
            in_specs=in_specs,
            out_specs=out_specs,
        ),
        compiler_params=pltpu.CompilerParams(
            dimension_semantics=("parallel",),      # B>=2 -> both v7x TCs used
            vmem_limit_bytes=32 * 1024 * 1024,      # explicit, safe on v5e/v6e/v7x
        ),
        cost_estimate=cost,
    )(x, *param_list)
    return out, None


# ---------------------------------------------------------------------------
# Pure-JAX reference (mirrors the PyTorch forward exactly, f32)
# ---------------------------------------------------------------------------
def transformer_reference(x, p, *, n_heads):
    eps = 1e-6
    B, N, D = x.shape
    hd = D // n_heads

    def ln(y, w, b):
        mu = jnp.mean(y, axis=-1, keepdims=True)
        var = jnp.mean((y - mu) ** 2, axis=-1, keepdims=True)
        return (y - mu) / jnp.sqrt(var + eps) * w + b

    residue = x
    xn = ln(x, p["ln1_w"][0], p["ln1_b"][0])
    q = xn @ p["wq"]
    k = xn @ p["wk"]
    v = xn @ p["wv"]
    q = q.reshape(B, N, n_heads, hd).transpose(0, 2, 1, 3)
    k = k.reshape(B, N, n_heads, hd).transpose(0, 2, 1, 3)
    v = v.reshape(B, N, n_heads, hd).transpose(0, 2, 1, 3)
    attn = jnp.einsum("bhqd,bhkd->bhqk", q, k) / np.sqrt(hd)
    attn = jax.nn.softmax(attn, axis=-1)
    out = jnp.einsum("bhqk,bhkd->bhqd", attn, v).transpose(0, 2, 1, 3).reshape(B, N, D)
    out = out @ p["wo"] + p["bo"][0]
    x = out + residue

    residue = x
    xn2 = ln(x, p["ln2_w"][0], p["ln2_b"][0])
    h1 = jnp.maximum(xn2 @ p["w1"] + p["b1"][0], 0.0)
    ff = h1 @ p["w2"] + p["b2"][0]
    return ff + residue


# ---------------------------------------------------------------------------
# Main
# ---------------------------------------------------------------------------
if __name__ == "__main__":
    # Small shapes consistent with the module:
    B, N, D = 2, 8, 32          # batch, sequence, dim
    n_heads = 4
    ff_hid = 64                 # ff_hid_dim

    key = jax.random.PRNGKey(0)
    keys = jax.random.split(key, 16)

    def rnd(k, shape, scale=0.1):
        return jax.random.normal(k, shape, dtype=jnp.float32) * scale

    params = {
        "ln1_w": jnp.ones((1, D), jnp.float32) + rnd(keys[0], (1, D), 0.05),
        "ln1_b": rnd(keys[1], (1, D), 0.05),
        "wq": rnd(keys[2], (D, D)),
        "wk": rnd(keys[3], (D, D)),
        "wv": rnd(keys[4], (D, D)),
        "wo": rnd(keys[5], (D, D)),
        "bo": rnd(keys[6], (1, D), 0.05),
        "ln2_w": jnp.ones((1, D), jnp.float32) + rnd(keys[7], (1, D), 0.05),
        "ln2_b": rnd(keys[8], (1, D), 0.05),
        "w1": rnd(keys[9], (D, ff_hid)),
        "b1": rnd(keys[10], (1, ff_hid), 0.05),
        "w2": rnd(keys[11], (ff_hid, D)),
        "b2": rnd(keys[12], (1, D), 0.05),
    }

    x = jax.random.normal(keys[13], (B, N, D), dtype=jnp.float32)

    ref = transformer_reference(x, params, n_heads=n_heads)

    # 1) exact-precision path (f32 MXU operands) -> tight correctness check
    out_f32, aux = transformer_forward(
        x, params, n_heads=n_heads, compute_dtype=jnp.float32
    )
    out_f32 = jax.block_until_ready(out_f32)
    np.testing.assert_allclose(np.asarray(out_f32), np.asarray(ref),
                               rtol=1e-4, atol=1e-4)

    # 2) performance path (bf16 MXU operands, f32 accumulate / LN / softmax)
    out_bf16, _ = transformer_forward(x, params, n_heads=n_heads)
    out_bf16 = jax.block_until_ready(out_bf16)
    np.testing.assert_allclose(np.asarray(out_bf16), np.asarray(ref),
                               rtol=5e-2, atol=5e-2)

    assert aux is None  # module returns (x, None) when not consistency/moe
    print("KERNEL_OK")
</pallas_src>

<mosaic_0001>
module attributes {stable_mosaic.version = 11 : i64} {
  func.func @_transformer_kernel(%arg0: i32, %arg1: memref<1x8x32xf32, #tpu.memory_space<vmem>>, %arg2: memref<1x32xf32, #tpu.memory_space<vmem>>, %arg3: memref<1x32xf32, #tpu.memory_space<vmem>>, %arg4: memref<12x32x8xf32, #tpu.memory_space<vmem>>, %arg5: memref<4x8x32xf32, #tpu.memory_space<vmem>>, %arg6: memref<1x32xf32, #tpu.memory_space<vmem>>, %arg7: memref<1x32xf32, #tpu.memory_space<vmem>>, %arg8: memref<1x32xf32, #tpu.memory_space<vmem>>, %arg9: memref<32x64xf32, #tpu.memory_space<vmem>>, %arg10: memref<1x64xf32, #tpu.memory_space<vmem>>, %arg11: memref<64x32xf32, #tpu.memory_space<vmem>>, %arg12: memref<1x32xf32, #tpu.memory_space<vmem>>, %arg13: memref<1x8x32xf32, #tpu.memory_space<vmem>>) attributes {dimension_semantics = [#tpu.dimension_semantics<parallel>], iteration_bounds = array<i64: 2>, scalar_prefetch = 0 : i64, scratch_operands = 0 : i64, tpu.core_type = #tpu.core_type<tc>, window_params = [{transform_indices = @transform_0, window_bounds = array<i64: 1, 8, 32>}, {pipeline_mode = #tpu.pipeline_mode<synchronous>, transform_indices = @transform_1, window_bounds = array<i64: 1, 32>}, {pipeline_mode = #tpu.pipeline_mode<synchronous>, transform_indices = @transform_2, window_bounds = array<i64: 1, 32>}, {pipeline_mode = #tpu.pipeline_mode<synchronous>, transform_indices = @transform_3, window_bounds = array<i64: 12, 32, 8>}, {pipeline_mode = #tpu.pipeline_mode<synchronous>, transform_indices = @transform_4, window_bounds = array<i64: 4, 8, 32>}, {pipeline_mode = #tpu.pipeline_mode<synchronous>, transform_indices = @transform_5, window_bounds = array<i64: 1, 32>}, {pipeline_mode = #tpu.pipeline_mode<synchronous>, transform_indices = @transform_6, window_bounds = array<i64: 1, 32>}, {pipeline_mode = #tpu.pipeline_mode<synchronous>, transform_indices = @transform_7, window_bounds = array<i64: 1, 32>}, {pipeline_mode = #tpu.pipeline_mode<synchronous>, transform_indices = @transform_8, window_bounds = array<i64: 32, 64>}, {pipeline_mode = #tpu.pipeline_mode<synchronous>, transform_indices = @transform_9, window_bounds = array<i64: 1, 64>}, {pipeline_mode = #tpu.pipeline_mode<synchronous>, transform_indices = @transform_10, window_bounds = array<i64: 64, 32>}, {pipeline_mode = #tpu.pipeline_mode<synchronous>, transform_indices = @transform_11, window_bounds = array<i64: 1, 32>}, {transform_indices = @transform_12, window_bounds = array<i64: 1, 8, 32>}]} {
    %c0 = arith.constant 0 : index
    %c0_0 = arith.constant 0 : index
    %c0_1 = arith.constant 0 : index
    %0 = vector.load %arg1[%c0, %c0_0, %c0_1] : memref<1x8x32xf32, #tpu.memory_space<vmem>>, vector<1x8x32xf32>
    %1 = vector.shape_cast %0 : vector<1x8x32xf32> to vector<8x32xf32>
    %cst = arith.constant dense<0.000000e+00> : vector<8xf32>
    %2 = vector.multi_reduction <add>, %1, %cst [1] : vector<8x32xf32> to vector<8xf32>
    %3 = vector.shape_cast %2 : vector<8xf32> to vector<8x1xf32>
    %cst_2 = arith.constant 3.200000e+01 : f32
    %4 = vector.broadcast %cst_2 : f32 to vector<8x1xf32>
    %5 = arith.divf %3, %4 : vector<8x1xf32>
    %6 = vector.broadcast %5 : vector<8x1xf32> to vector<8x32xf32>
    %7 = arith.subf %1, %6 : vector<8x32xf32>
    %8 = arith.mulf %7, %7 : vector<8x32xf32>
    %cst_3 = arith.constant dense<0.000000e+00> : vector<8xf32>
    %9 = vector.multi_reduction <add>, %8, %cst_3 [1] : vector<8x32xf32> to vector<8xf32>
    %10 = vector.shape_cast %9 : vector<8xf32> to vector<8x1xf32>
    %cst_4 = arith.constant 3.200000e+01 : f32
    %11 = vector.broadcast %cst_4 : f32 to vector<8x1xf32>
    %12 = arith.divf %10, %11 : vector<8x1xf32>
    %13 = vector.broadcast %5 : vector<8x1xf32> to vector<8x32xf32>
    %14 = arith.subf %1, %13 : vector<8x32xf32>
    %cst_5 = arith.constant 9.99999997E-7 : f32
    %15 = vector.broadcast %cst_5 : f32 to vector<8x1xf32>
    %16 = arith.addf %12, %15 : vector<8x1xf32>
    %17 = math.rsqrt %16 : vector<8x1xf32>
    %18 = vector.broadcast %17 : vector<8x1xf32> to vector<8x32xf32>
    %19 = arith.mulf %14, %18 : vector<8x32xf32>
    %c0_6 = arith.constant 0 : index
    %c0_7 = arith.constant 0 : index
    %20 = vector.load %arg2[%c0_6, %c0_7] : memref<1x32xf32, #tpu.memory_space<vmem>>, vector<1x32xf32>
    %21 = vector.broadcast %20 : vector<1x32xf32> to vector<8x32xf32>
    %22 = arith.mulf %19, %21 : vector<8x32xf32>
    %c0_8 = arith.constant 0 : index
    %c0_9 = arith.constant 0 : index
    %23 = vector.load %arg3[%c0_8, %c0_9] : memref<1x32xf32, #tpu.memory_space<vmem>>, vector<1x32xf32>
    %24 = vector.broadcast %23 : vector<1x32xf32> to vector<8x32xf32>
    %25 = arith.addf %22, %24 : vector<8x32xf32>
    %c0_10 = arith.constant 0 : index
    %c0_11 = arith.constant 0 : index
    %c0_12 = arith.constant 0 : index
    %26 = vector.load %arg4[%c0_10, %c0_11, %c0_12] : memref<12x32x8xf32, #tpu.memory_space<vmem>>, vector<1x32x8xf32>
    %27 = vector.shape_cast %26 : vector<1x32x8xf32> to vector<32x8xf32>
    %cst_13 = arith.constant dense<0.000000e+00> : vector<8x8xf32>
    %28 = tpu.matmul %25, %27, %cst_13 {dimension_numbers = #tpu.dot_dimension_numbers<[1], [0], [0], [1], [0, 0, 1, 1], [], []>} : vector<8x32xf32>, vector<32x8xf32>, vector<8x8xf32> -> vector<8x8xf32>
    %c4 = arith.constant 4 : index
    %c0_14 = arith.constant 0 : index
    %c0_15 = arith.constant 0 : index
    %29 = vector.load %arg4[%c4, %c0_14, %c0_15] : memref<12x32x8xf32, #tpu.memory_space<vmem>>, vector<1x32x8xf32>
    %30 = vector.shape_cast %29 : vector<1x32x8xf32> to vector<32x8xf32>
    %cst_16 = arith.constant dense<0.000000e+00> : vector<8x8xf32>
    %31 = tpu.matmul %25, %30, %cst_16 {dimension_numbers = #tpu.dot_dimension_numbers<[1], [0], [0], [1], [0, 0, 1, 1], [], []>} : vector<8x32xf32>, vector<32x8xf32>, vector<8x8xf32> -> vector<8x8xf32>
    %c8 = arith.constant 8 : index
    %c0_17 = arith.constant 0 : index
    %c0_18 = arith.constant 0 : index
    %32 = vector.load %arg4[%c8, %c0_17, %c0_18] : memref<12x32x8xf32, #tpu.memory_space<vmem>>, vector<1x32x8xf32>
    %33 = vector.shape_cast %32 : vector<1x32x8xf32> to vector<32x8xf32>
    %cst_19 = arith.constant dense<0.000000e+00> : vector<8x8xf32>
    %34 = tpu.matmul %25, %33, %cst_19 {dimension_numbers = #tpu.dot_dimension_numbers<[1], [0], [0], [1], [0, 0, 1, 1], [], []>} : vector<8x32xf32>, vector<32x8xf32>, vector<8x8xf32> -> vector<8x8xf32>
    %cst_20 = arith.constant dense<0.000000e+00> : vector<8x8xf32>
    %35 = tpu.matmul %28, %31, %cst_20 {dimension_numbers = #tpu.dot_dimension_numbers<[1], [1], [0], [0], [0, 0, 1, 0], [], []>} : vector<8x8xf32>, vector<8x8xf32>, vector<8x8xf32> -> vector<8x8xf32>
    %cst_21 = arith.constant 0.353553385 : f32
    %36 = vector.broadcast %cst_21 : f32 to vector<8x8xf32>
    %37 = arith.mulf %35, %36 : vector<8x8xf32>
    %cst_22 = arith.constant dense<0xFF800000> : vector<8xf32>
    %38 = vector.multi_reduction <maximumf>, %37, %cst_22 [1] : vector<8x8xf32> to vector<8xf32>
    %39 = vector.shape_cast %38 : vector<8xf32> to vector<8x1xf32>
    %40 = vector.broadcast %39 : vector<8x1xf32> to vector<8x8xf32>
    %41 = arith.subf %37, %40 : vector<8x8xf32>
    %42 = math.exp %41 : vector<8x8xf32>
    %cst_23 = arith.constant dense<0.000000e+00> : vector<8xf32>
    %43 = vector.multi_reduction <add>, %42, %cst_23 [1] : vector<8x8xf32> to vector<8xf32>
    %44 = vector.shape_cast %43 : vector<8xf32> to vector<8x1xf32>
    %45 = tpu.reciprocal %44 : vector<8x1xf32> -> vector<8x1xf32>
    %46 = vector.broadcast %45 : vector<8x1xf32> to vector<8x8xf32>
    %47 = arith.mulf %42, %46 : vector<8x8xf32>
    %cst_24 = arith.constant dense<0.000000e+00> : vector<8x8xf32>
    %48 = tpu.matmul %47, %34, %cst_24 {dimension_numbers = #tpu.dot_dimension_numbers<[1], [0], [0], [1], [0, 0, 1, 1], [], []>} : vector<8x8xf32>, vector<8x8xf32>, vector<8x8xf32> -> vector<8x8xf32>
    %c0_25 = arith.constant 0 : index
    %c0_26 = arith.constant 0 : index
    %c0_27 = arith.constant 0 : index
    %49 = vector.load %arg5[%c0_25, %c0_26, %c0_27] : memref<4x8x32xf32, #tpu.memory_space<vmem>>, vector<1x8x32xf32>
    %50 = vector.shape_cast %49 : vector<1x8x32xf32> to vector<8x32xf32>
    %cst_28 = arith.constant dense<0.000000e+00> : vector<8x32xf32>
    %51 = tpu.matmul %48, %50, %cst_28 {dimension_numbers = #tpu.dot_dimension_numbers<[1], [0], [0], [1], [0, 0, 1, 1], [], []>} : vector<8x8xf32>, vector<8x32xf32>, vector<8x32xf32> -> vector<8x32xf32>
    %c1 = arith.constant 1 : index
    %c0_29 = arith.constant 0 : index
    %c0_30 = arith.constant 0 : index
    %52 = vector.load %arg4[%c1, %c0_29, %c0_30] : memref<12x32x8xf32, #tpu.memory_space<vmem>>, vector<1x32x8xf32>
    %53 = vector.shape_cast %52 : vector<1x32x8xf32> to vector<32x8xf32>
    %cst_31 = arith.constant dense<0.000000e+00> : vector<8x8xf32>
    %54 = tpu.matmul %25, %53, %cst_31 {dimension_numbers = #tpu.dot_dimension_numbers<[1], [0], [0], [1], [0, 0, 1, 1], [], []>} : vector<8x32xf32>, vector<32x8xf32>, vector<8x8xf32> -> vector<8x8xf32>
    %c5 = arith.constant 5 : index
    %c0_32 = arith.constant 0 : index
    %c0_33 = arith.constant 0 : index
    %55 = vector.load %arg4[%c5, %c0_32, %c0_33] : memref<12x32x8xf32, #tpu.memory_space<vmem>>, vector<1x32x8xf32>
    %56 = vector.shape_cast %55 : vector<1x32x8xf32> to vector<32x8xf32>
    %cst_34 = arith.constant dense<0.000000e+00> : vector<8x8xf32>
    %57 = tpu.matmul %25, %56, %cst_34 {dimension_numbers = #tpu.dot_dimension_numbers<[1], [0], [0], [1], [0, 0, 1, 1], [], []>} : vector<8x32xf32>, vector<32x8xf32>, vector<8x8xf32> -> vector<8x8xf32>
    %c9 = arith.constant 9 : index
    %c0_35 = arith.constant 0 : index
    %c0_36 = arith.constant 0 : index
    %58 = vector.load %arg4[%c9, %c0_35, %c0_36] : memref<12x32x8xf32, #tpu.memory_space<vmem>>, vector<1x32x8xf32>
    %59 = vector.shape_cast %58 : vector<1x32x8xf32> to vector<32x8xf32>
    %cst_37 = arith.constant dense<0.000000e+00> : vector<8x8xf32>
    %60 = tpu.matmul %25, %59, %cst_37 {dimension_numbers = #tpu.dot_dimension_numbers<[1], [0], [0], [1], [0, 0, 1, 1], [], []>} : vector<8x32xf32>, vector<32x8xf32>, vector<8x8xf32> -> vector<8x8xf32>
    %cst_38 = arith.constant dense<0.000000e+00> : vector<8x8xf32>
    %61 = tpu.matmul %54, %57, %cst_38 {dimension_numbers = #tpu.dot_dimension_numbers<[1], [1], [0], [0], [0, 0, 1, 0], [], []>} : vector<8x8xf32>, vector<8x8xf32>, vector<8x8xf32> -> vector<8x8xf32>
    %cst_39 = arith.constant 0.353553385 : f32
    %62 = vector.broadcast %cst_39 : f32 to vector<8x8xf32>
    %63 = arith.mulf %61, %62 : vector<8x8xf32>
    %cst_40 = arith.constant dense<0xFF800000> : vector<8xf32>
    %64 = vector.multi_reduction <maximumf>, %63, %cst_40 [1] : vector<8x8xf32> to vector<8xf32>
    %65 = vector.shape_cast %64 : vector<8xf32> to vector<8x1xf32>
    %66 = vector.broadcast %65 : vector<8x1xf32> to vector<8x8xf32>
    %67 = arith.subf %63, %66 : vector<8x8xf32>
    %68 = math.exp %67 : vector<8x8xf32>
    %cst_41 = arith.constant dense<0.000000e+00> : vector<8xf32>
    %69 = vector.multi_reduction <add>, %68, %cst_41 [1] : vector<8x8xf32> to vector<8xf32>
    %70 = vector.shape_cast %69 : vector<8xf32> to vector<8x1xf32>
    %71 = tpu.reciprocal %70 : vector<8x1xf32> -> vector<8x1xf32>
    %72 = vector.broadcast %71 : vector<8x1xf32> to vector<8x8xf32>
    %73 = arith.mulf %68, %72 : vector<8x8xf32>
    %cst_42 = arith.constant dense<0.000000e+00> : vector<8x8xf32>
    %74 = tpu.matmul %73, %60, %cst_42 {dimension_numbers = #tpu.dot_dimension_numbers<[1], [0], [0], [1], [0, 0, 1, 1], [], []>} : vector<8x8xf32>, vector<8x8xf32>, vector<8x8xf32> -> vector<8x8xf32>
    %c1_43 = arith.constant 1 : index
    %c0_44 = arith.constant 0 : index
    %c0_45 = arith.constant 0 : index
    %75 = vector.load %arg5[%c1_43, %c0_44, %c0_45] : memref<4x8x32xf32, #tpu.memory_space<vmem>>, vector<1x8x32xf32>
    %76 = vector.shape_cast %75 : vector<1x8x32xf32> to vector<8x32xf32>
    %cst_46 = arith.constant dense<0.000000e+00> : vector<8x32xf32>
    %77 = tpu.matmul %74, %76, %cst_46 {dimension_numbers = #tpu.dot_dimension_numbers<[1], [0], [0], [1], [0, 0, 1, 1], [], []>} : vector<8x8xf32>, vector<8x32xf32>, vector<8x32xf32> -> vector<8x32xf32>
    %78 = arith.addf %51, %77 : vector<8x32xf32>
    %c2 = arith.constant 2 : index
    %c0_47 = arith.constant 0 : index
    %c0_48 = arith.constant 0 : index
    %79 = vector.load %arg4[%c2, %c0_47, %c0_48] : memref<12x32x8xf32, #tpu.memory_space<vmem>>, vector<1x32x8xf32>
    %80 = vector.shape_cast %79 : vector<1x32x8xf32> to vector<32x8xf32>
    %cst_49 = arith.constant dense<0.000000e+00> : vector<8x8xf32>
    %81 = tpu.matmul %25, %80, %cst_49 {dimension_numbers = #tpu.dot_dimension_numbers<[1], [0], [0], [1], [0, 0, 1, 1], [], []>} : vector<8x32xf32>, vector<32x8xf32>, vector<8x8xf32> -> vector<8x8xf32>
    %c6 = arith.constant 6 : index
    %c0_50 = arith.constant 0 : index
    %c0_51 = arith.constant 0 : index
    %82 = vector.load %arg4[%c6, %c0_50, %c0_51] : memref<12x32x8xf32, #tpu.memory_space<vmem>>, vector<1x32x8xf32>
    %83 = vector.shape_cast %82 : vector<1x32x8xf32> to vector<32x8xf32>
    %cst_52 = arith.constant dense<0.000000e+00> : vector<8x8xf32>
    %84 = tpu.matmul %25, %83, %cst_52 {dimension_numbers = #tpu.dot_dimension_numbers<[1], [0], [0], [1], [0, 0, 1, 1], [], []>} : vector<8x32xf32>, vector<32x8xf32>, vector<8x8xf32> -> vector<8x8xf32>
    %c10 = arith.constant 10 : index
    %c0_53 = arith.constant 0 : index
    %c0_54 = arith.constant 0 : index
    %85 = vector.load %arg4[%c10, %c0_53, %c0_54] : memref<12x32x8xf32, #tpu.memory_space<vmem>>, vector<1x32x8xf32>
    %86 = vector.shape_cast %85 : vector<1x32x8xf32> to vector<32x8xf32>
    %cst_55 = arith.constant dense<0.000000e+00> : vector<8x8xf32>
    %87 = tpu.matmul %25, %86, %cst_55 {dimension_numbers = #tpu.dot_dimension_numbers<[1], [0], [0], [1], [0, 0, 1, 1], [], []>} : vector<8x32xf32>, vector<32x8xf32>, vector<8x8xf32> -> vector<8x8xf32>
    %cst_56 = arith.constant dense<0.000000e+00> : vector<8x8xf32>
    %88 = tpu.matmul %81, %84, %cst_56 {dimension_numbers = #tpu.dot_dimension_numbers<[1], [1], [0], [0], [0, 0, 1, 0], [], []>} : vector<8x8xf32>, vector<8x8xf32>, vector<8x8xf32> -> vector<8x8xf32>
    %cst_57 = arith.constant 0.353553385 : f32
    %89 = vector.broadcast %cst_57 : f32 to vector<8x8xf32>
    %90 = arith.mulf %88, %89 : vector<8x8xf32>
    %cst_58 = arith.constant dense<0xFF800000> : vector<8xf32>
    %91 = vector.multi_reduction <maximumf>, %90, %cst_58 [1] : vector<8x8xf32> to vector<8xf32>
    %92 = vector.shape_cast %91 : vector<8xf32> to vector<8x1xf32>
    %93 = vector.broadcast %92 : vector<8x1xf32> to vector<8x8xf32>
    %94 = arith.subf %90, %93 : vector<8x8xf32>
    %95 = math.exp %94 : vector<8x8xf32>
    %cst_59 = arith.constant dense<0.000000e+00> : vector<8xf32>
    %96 = vector.multi_reduction <add>, %95, %cst_59 [1] : vector<8x8xf32> to vector<8xf32>
    %97 = vector.shape_cast %96 : vector<8xf32> to vector<8x1xf32>
    %98 = tpu.reciprocal %97 : vector<8x1xf32> -> vector<8x1xf32>
    %99 = vector.broadcast %98 : vector<8x1xf32> to vector<8x8xf32>
    %100 = arith.mulf %95, %99 : vector<8x8xf32>
    %cst_60 = arith.constant dense<0.000000e+00> : vector<8x8xf32>
    %101 = tpu.matmul %100, %87, %cst_60 {dimension_numbers = #tpu.dot_dimension_numbers<[1], [0], [0], [1], [0, 0, 1, 1], [], []>} : vector<8x8xf32>, vector<8x8xf32>, vector<8x8xf32> -> vector<8x8xf32>
    %c2_61 = arith.constant 2 : index
    %c0_62 = arith.constant 0 : index
    %c0_63 = arith.constant 0 : index
    %102 = vector.load %arg5[%c2_61, %c0_62, %c0_63] : memref<4x8x32xf32, #tpu.memory_space<vmem>>, vector<1x8x32xf32>
    %103 = vector.shape_cast %102 : vector<1x8x32xf32> to vector<8x32xf32>
    %cst_64 = arith.constant dense<0.000000e+00> : vector<8x32xf32>
    %104 = tpu.matmul %101, %103, %cst_64 {dimension_numbers = #tpu.dot_dimension_numbers<[1], [0], [0], [1], [0, 0, 1, 1], [], []>} : vector<8x8xf32>, vector<8x32xf32>, vector<8x32xf32> -> vector<8x32xf32>
    %105 = arith.addf %78, %104 : vector<8x32xf32>
    %c3 = arith.constant 3 : index
    %c0_65 = arith.constant 0 : index
    %c0_66 = arith.constant 0 : index
    %106 = vector.load %arg4[%c3, %c0_65, %c0_66] : memref<12x32x8xf32, #tpu.memory_space<vmem>>, vector<1x32x8xf32>
    %107 = vector.shape_cast %106 : vector<1x32x8xf32> to vector<32x8xf32>
    %cst_67 = arith.constant dense<0.000000e+00> : vector<8x8xf32>
    %108 = tpu.matmul %25, %107, %cst_67 {dimension_numbers = #tpu.dot_dimension_numbers<[1], [0], [0], [1], [0, 0, 1, 1], [], []>} : vector<8x32xf32>, vector<32x8xf32>, vector<8x8xf32> -> vector<8x8xf32>
    %c7 = arith.constant 7 : index
    %c0_68 = arith.constant 0 : index
    %c0_69 = arith.constant 0 : index
    %109 = vector.load %arg4[%c7, %c0_68, %c0_69] : memref<12x32x8xf32, #tpu.memory_space<vmem>>, vector<1x32x8xf32>
    %110 = vector.shape_cast %109 : vector<1x32x8xf32> to vector<32x8xf32>
    %cst_70 = arith.constant dense<0.000000e+00> : vector<8x8xf32>
    %111 = tpu.matmul %25, %110, %cst_70 {dimension_numbers = #tpu.dot_dimension_numbers<[1], [0], [0], [1], [0, 0, 1, 1], [], []>} : vector<8x32xf32>, vector<32x8xf32>, vector<8x8xf32> -> vector<8x8xf32>
    %c11 = arith.constant 11 : index
    %c0_71 = arith.constant 0 : index
    %c0_72 = arith.constant 0 : index
    %112 = vector.load %arg4[%c11, %c0_71, %c0_72] : memref<12x32x8xf32, #tpu.memory_space<vmem>>, vector<1x32x8xf32>
    %113 = vector.shape_cast %112 : vector<1x32x8xf32> to vector<32x8xf32>
    %cst_73 = arith.constant dense<0.000000e+00> : vector<8x8xf32>
    %114 = tpu.matmul %25, %113, %cst_73 {dimension_numbers = #tpu.dot_dimension_numbers<[1], [0], [0], [1], [0, 0, 1, 1], [], []>} : vector<8x32xf32>, vector<32x8xf32>, vector<8x8xf32> -> vector<8x8xf32>
    %cst_74 = arith.constant dense<0.000000e+00> : vector<8x8xf32>
    %115 = tpu.matmul %108, %111, %cst_74 {dimension_numbers = #tpu.dot_dimension_numbers<[1], [1], [0], [0], [0, 0, 1, 0], [], []>} : vector<8x8xf32>, vector<8x8xf32>, vector<8x8xf32> -> vector<8x8xf32>
    %cst_75 = arith.constant 0.353553385 : f32
    %116 = vector.broadcast %cst_75 : f32 to vector<8x8xf32>
    %117 = arith.mulf %115, %116 : vector<8x8xf32>
    %cst_76 = arith.constant dense<0xFF800000> : vector<8xf32>
    %118 = vector.multi_reduction <maximumf>, %117, %cst_76 [1] : vector<8x8xf32> to vector<8xf32>
    %119 = vector.shape_cast %118 : vector<8xf32> to vector<8x1xf32>
    %120 = vector.broadcast %119 : vector<8x1xf32> to vector<8x8xf32>
    %121 = arith.subf %117, %120 : vector<8x8xf32>
    %122 = math.exp %121 : vector<8x8xf32>
    %cst_77 = arith.constant dense<0.000000e+00> : vector<8xf32>
    %123 = vector.multi_reduction <add>, %122, %cst_77 [1] : vector<8x8xf32> to vector<8xf32>
    %124 = vector.shape_cast %123 : vector<8xf32> to vector<8x1xf32>
    %125 = tpu.reciprocal %124 : vector<8x1xf32> -> vector<8x1xf32>
    %126 = vector.broadcast %125 : vector<8x1xf32> to vector<8x8xf32>
    %127 = arith.mulf %122, %126 : vector<8x8xf32>
    %cst_78 = arith.constant dense<0.000000e+00> : vector<8x8xf32>
    %128 = tpu.matmul %127, %114, %cst_78 {dimension_numbers = #tpu.dot_dimension_numbers<[1], [0], [0], [1], [0, 0, 1, 1], [], []>} : vector<8x8xf32>, vector<8x8xf32>, vector<8x8xf32> -> vector<8x8xf32>
    %c3_79 = arith.constant 3 : index
    %c0_80 = arith.constant 0 : index
    %c0_81 = arith.constant 0 : index
    %129 = vector.load %arg5[%c3_79, %c0_80, %c0_81] : memref<4x8x32xf32, #tpu.memory_space<vmem>>, vector<1x8x32xf32>
    %130 = vector.shape_cast %129 : vector<1x8x32xf32> to vector<8x32xf32>
    %cst_82 = arith.constant dense<0.000000e+00> : vector<8x32xf32>
    %131 = tpu.matmul %128, %130, %cst_82 {dimension_numbers = #tpu.dot_dimension_numbers<[1], [0], [0], [1], [0, 0, 1, 1], [], []>} : vector<8x8xf32>, vector<8x32xf32>, vector<8x32xf32> -> vector<8x32xf32>
    %132 = arith.addf %105, %131 : vector<8x32xf32>
    %c0_83 = arith.constant 0 : index
    %c0_84 = arith.constant 0 : index
    %133 = vector.load %arg6[%c0_83, %c0_84] : memref<1x32xf32, #tpu.memory_space<vmem>>, vector<1x32xf32>
    %134 = vector.broadcast %133 : vector<1x32xf32> to vector<8x32xf32>
    %135 = arith.addf %132, %134 : vector<8x32xf32>
    %136 = arith.addf %135, %1 : vector<8x32xf32>
    %cst_85 = arith.constant dense<0.000000e+00> : vector<8xf32>
    %137 = vector.multi_reduction <add>, %136, %cst_85 [1] : vector<8x32xf32> to vector<8xf32>
    %138 = vector.shape_cast %137 : vector<8xf32> to vector<8x1xf32>
    %cst_86 = arith.constant 3.200000e+01 : f32
    %139 = vector.broadcast %cst_86 : f32 to vector<8x1xf32>
    %140 = arith.divf %138, %139 : vector<8x1xf32>
    %141 = vector.broadcast %140 : vector<8x1xf32> to vector<8x32xf32>
    %142 = arith.subf %136, %141 : vector<8x32xf32>
    %143 = arith.mulf %142, %142 : vector<8x32xf32>
    %cst_87 = arith.constant dense<0.000000e+00> : vector<8xf32>
    %144 = vector.multi_reduction <add>, %143, %cst_87 [1] : vector<8x32xf32> to vector<8xf32>
    %145 = vector.shape_cast %144 : vector<8xf32> to vector<8x1xf32>
    %cst_88 = arith.constant 3.200000e+01 : f32
    %146 = vector.broadcast %cst_88 : f32 to vector<8x1xf32>
    %147 = arith.divf %145, %146 : vector<8x1xf32>
    %148 = vector.broadcast %140 : vector<8x1xf32> to vector<8x32xf32>
    %149 = arith.subf %136, %148 : vector<8x32xf32>
    %cst_89 = arith.constant 9.99999997E-7 : f32
    %150 = vector.broadcast %cst_89 : f32 to vector<8x1xf32>
    %151 = arith.addf %147, %150 : vector<8x1xf32>
    %152 = math.rsqrt %151 : vector<8x1xf32>
    %153 = vector.broadcast %152 : vector<8x1xf32> to vector<8x32xf32>
    %154 = arith.mulf %149, %153 : vector<8x32xf32>
    %c0_90 = arith.constant 0 : index
    %c0_91 = arith.constant 0 : index
    %155 = vector.load %arg7[%c0_90, %c0_91] : memref<1x32xf32, #tpu.memory_space<vmem>>, vector<1x32xf32>
    %156 = vector.broadcast %155 : vector<1x32xf32> to vector<8x32xf32>
    %157 = arith.mulf %154, %156 : vector<8x32xf32>
    %c0_92 = arith.constant 0 : index
    %c0_93 = arith.constant 0 : index
    %158 = vector.load %arg8[%c0_92, %c0_93] : memref<1x32xf32, #tpu.memory_space<vmem>>, vector<1x32xf32>
    %159 = vector.broadcast %158 : vector<1x32xf32> to vector<8x32xf32>
    %160 = arith.addf %157, %159 : vector<8x32xf32>
    %c0_94 = arith.constant 0 : index
    %c0_95 = arith.constant 0 : index
    %161 = vector.load %arg9[%c0_94, %c0_95] : memref<32x64xf32, #tpu.memory_space<vmem>>, vector<32x64xf32>
    %cst_96 = arith.constant dense<0.000000e+00> : vector<8x64xf32>
    %162 = tpu.matmul %160, %161, %cst_96 {dimension_numbers = #tpu.dot_dimension_numbers<[1], [0], [0], [1], [0, 0, 1, 1], [], []>} : vector<8x32xf32>, vector<32x64xf32>, vector<8x64xf32> -> vector<8x64xf32>
    %c0_97 = arith.constant 0 : index
    %c0_98 = arith.constant 0 : index
    %163 = vector.load %arg10[%c0_97, %c0_98] : memref<1x64xf32, #tpu.memory_space<vmem>>, vector<1x64xf32>
    %164 = vector.broadcast %163 : vector<1x64xf32> to vector<8x64xf32>
    %165 = arith.addf %162, %164 : vector<8x64xf32>
    %cst_99 = arith.constant 0.000000e+00 : f32
    %166 = vector.broadcast %cst_99 : f32 to vector<8x64xf32>
    %167 = arith.maximumf %165, %166 : vector<8x64xf32>
    %c0_100 = arith.constant 0 : index
    %c0_101 = arith.constant 0 : index
    %168 = vector.load %arg11[%c0_100, %c0_101] : memref<64x32xf32, #tpu.memory_space<vmem>>, vector<64x32xf32>
    %cst_102 = arith.constant dense<0.000000e+00> : vector<8x32xf32>
    %169 = tpu.matmul %167, %168, %cst_102 {dimension_numbers = #tpu.dot_dimension_numbers<[1], [0], [0], [1], [0, 0, 1, 1], [], []>} : vector<8x64xf32>, vector<64x32xf32>, vector<8x32xf32> -> vector<8x32xf32>
    %c0_103 = arith.constant 0 : index
    %c0_104 = arith.constant 0 : index
    %170 = vector.load %arg12[%c0_103, %c0_104] : memref<1x32xf32, #tpu.memory_space<vmem>>, vector<1x32xf32>
    %171 = vector.broadcast %170 : vector<1x32xf32> to vector<8x32xf32>
    %172 = arith.addf %169, %171 : vector<8x32xf32>
    %173 = arith.addf %172, %136 : vector<8x32xf32>
    %c0_105 = arith.constant 0 : index
    %c0_106 = arith.constant 0 : index
    %c0_107 = arith.constant 0 : index
    %174 = vector.load %arg13[%c0_105, %c0_106, %c0_107] : memref<1x8x32xf32, #tpu.memory_space<vmem>>, vector<1x8x32xf32>
    %175 = vector.shape_cast %174 : vector<1x8x32xf32> to vector<8x32xf32>
    %176 = vector.shape_cast %173 : vector<8x32xf32> to vector<1x8x32xf32>
    tpu.vector_store %arg13[%c0_105, %c0_106, %c0_107], %176 {strides = array<i32>} : memref<1x8x32xf32, #tpu.memory_space<vmem>>, vector<1x8x32xf32>,
    return
  }
  func.func @transform_0(%arg0: i32) -> (i32, i32, i32) {
    %c0_i32 = arith.constant 0 : i32
    %c0_i32_0 = arith.constant 0 : i32
    %c0_i32_1 = arith.constant 0 : i32
    return %arg0, %c0_i32, %c0_i32_0 : i32, i32, i32
  }
  func.func @transform_1(%arg0: i32) -> (i32, i32) {
    %c0_i32 = arith.constant 0 : i32
    %c0_i32_0 = arith.constant 0 : i32
    %c0_i32_1 = arith.constant 0 : i32
    return %c0_i32, %c0_i32_0 : i32, i32
  }
  func.func @transform_2(%arg0: i32) -> (i32, i32) {
    %c0_i32 = arith.constant 0 : i32
    %c0_i32_0 = arith.constant 0 : i32
    %c0_i32_1 = arith.constant 0 : i32
    return %c0_i32, %c0_i32_0 : i32, i32
  }
  func.func @transform_3(%arg0: i32) -> (i32, i32, i32) {
    %c0_i32 = arith.constant 0 : i32
    %c0_i32_0 = arith.constant 0 : i32
    %c0_i32_1 = arith.constant 0 : i32
    %c0_i32_2 = arith.constant 0 : i32
    return %c0_i32, %c0_i32_0, %c0_i32_1 : i32, i32, i32
  }
  func.func @transform_4(%arg0: i32) -> (i32, i32, i32) {
    %c0_i32 = arith.constant 0 : i32
    %c0_i32_0 = arith.constant 0 : i32
    %c0_i32_1 = arith.constant 0 : i32
    %c0_i32_2 = arith.constant 0 : i32
    return %c0_i32, %c0_i32_0, %c0_i32_1 : i32, i32, i32
  }
  func.func @transform_5(%arg0: i32) -> (i32, i32) {
    %c0_i32 = arith.constant 0 : i32
    %c0_i32_0 = arith.constant 0 : i32
    %c0_i32_1 = arith.constant 0 : i32
    return %c0_i32, %c0_i32_0 : i32, i32
  }
  func.func @transform_6(%arg0: i32) -> (i32, i32) {
    %c0_i32 = arith.constant 0 : i32
    %c0_i32_0 = arith.constant 0 : i32
    %c0_i32_1 = arith.constant 0 : i32
    return %c0_i32, %c0_i32_0 : i32, i32
  }
  func.func @transform_7(%arg0: i32) -> (i32, i32) {
    %c0_i32 = arith.constant 0 : i32
    %c0_i32_0 = arith.constant 0 : i32
    %c0_i32_1 = arith.constant 0 : i32
    return %c0_i32, %c0_i32_0 : i32, i32
  }
  func.func @transform_8(%arg0: i32) -> (i32, i32) {
    %c0_i32 = arith.constant 0 : i32
    %c0_i32_0 = arith.constant 0 : i32
    %c0_i32_1 = arith.constant 0 : i32
    return %c0_i32, %c0_i32_0 : i32, i32
  }
  func.func @transform_9(%arg0: i32) -> (i32, i32) {
    %c0_i32 = arith.constant 0 : i32
    %c0_i32_0 = arith.constant 0 : i32
    %c0_i32_1 = arith.constant 0 : i32
    return %c0_i32, %c0_i32_0 : i32, i32
  }
  func.func @transform_10(%arg0: i32) -> (i32, i32) {
    %c0_i32 = arith.constant 0 : i32
    %c0_i32_0 = arith.constant 0 : i32
    %c0_i32_1 = arith.constant 0 : i32
    return %c0_i32, %c0_i32_0 : i32, i32
  }
  func.func @transform_11(%arg0: i32) -> (i32, i32) {
    %c0_i32 = arith.constant 0 : i32
    %c0_i32_0 = arith.constant 0 : i32
    %c0_i32_1 = arith.constant 0 : i32
    return %c0_i32, %c0_i32_0 : i32, i32
  }
  func.func @transform_12(%arg0: i32) -> (i32, i32, i32) {
    %c0_i32 = arith.constant 0 : i32
    %c0_i32_0 = arith.constant 0 : i32
    %c0_i32_1 = arith.constant 0 : i32
    return %arg0, %c0_i32, %c0_i32_0 : i32, i32, i32
  }
}

</mosaic_0001>

<bundles_post_ra>
// kernel: tpu_custom_call.1
= control target key start
LH: loop header
LB: loop body
LE: loop exit
PB: predicated region body
PF: predicated region fallthrough
CT: control target
= control target key end

     0   :  { %s3677_s0 = inlined_call_operand.vmem [shape: f32[2,8,32], index: 0, kind: input, shape index: {}]   ;;  %s3678_s1 = inlined_call_operand.vmem [shape: f32[1,32], index: 1, kind: input, shape index: {}]   ;;  %s3679_s2 = inlined_call_operand.vmem [shape: f32[1,32], index: 2, kind: input, shape index: {}]   ;;  %s3680_s3 = inlined_call_operand.vmem [shape: f32[12,32,8], index: 3, kind: input, shape index: {}]   ;;  %s3681_s4 = inlined_call_operand.vmem [shape: f32[4,8,32], index: 4, kind: input, shape index: {}]   ;;  %s3682_s5 = inlined_call_operand.vmem [shape: f32[1,32], index: 5, kind: input, shape index: {}]   ;;  %s3683_s6 = inlined_call_operand.vmem [shape: f32[1,32], index: 6, kind: input, shape index: {}]   ;;  %s3684_s7 = inlined_call_operand.vmem [shape: f32[1,32], index: 7, kind: input, shape index: {}]   ;;  %s3685_s8 = inlined_call_operand.vmem [shape: f32[32,64], index: 8, kind: input, shape index: {}]   ;;  %s3686_s9 = inlined_call_operand.vmem [shape: f32[1,64], index: 9, kind: input, shape index: {}]   ;;  %s3687_s10 = inlined_call_operand.vmem [shape: f32[64,32], index: 10, kind: input, shape index: {}]   ;;  %s3688_s11 = inlined_call_operand.vmem [shape: f32[1,32], index: 11, kind: input, shape index: {}]   ;;  %s3689_s12 = inlined_call_operand.hbm [shape: f32[2,8,32], index: 12, kind: output, shape index: {}]  }
   0x1   :  { %3690 = sst [smem:[#allocation5_spill]] %s3677_s0 }
   0x2   :  { %3691 = sst [smem:[#allocation6_spill]] %s3678_s1 }
   0x3   :  { %3692 = sst [smem:[#allocation7_spill]] %s3679_s2 }
   0x4   :  { %17 = vsyncpa [#allocation3], 0 }
   0x5   :  { %19 = vsyncpa [#allocation3 + $0x1], 0  ;;  %s3181_s21 = smov 0   ;;  %s3183_s22 = smov 0  }
   0x6   :  { %s3185_s23 = smov 0   ;;  %s3187_s24 = smov 0  }
   0x7 LB: > { %s3202_s25 = sadd.s32 4294967295, %s3111_s24   ;;  %s2576_s26 = sadd.s32 4294967294, %s3111_s24   ;;  %s3111_s24 = sphi %s3187_s24, %s3701_s24   ;;  %s3107_s23 = sphi %s3185_s23, %s3700_s23   ;;  %s3103_s22 = sphi %s3183_s22, %s3699_s22   ;;  %s3099_s21 = sphi %s3181_s21, %s3698_s21  }
   0x8   : > { %s3206_s27 = sadd.s32 1, %s3111_s24   ;;  %s289_s28 = sadd.s32 1, %s3107_s23 }
   0x9   : > { %s286_s29 = ssub.s32 %s3111_s24, %s3206_s27  ;;  %p299_p0 = scmp.ne.s32.totalorder %s3107_s23, %s3103_s22 }
   0xa   : > { %p287_p1 = scmp.eq.s32.totalorder %s286_s29, 0  ;;  %p300_p2 = scmp.eq.s32.totalorder %s3202_s25, 1 }
   0xb   : > { %p305_p3 = scmp.ne.s32.totalorder %s3103_s22, %s3099_s21  ;;  %p306_p4 = scmp.eq.s32.totalorder %s2576_s26, 1 }
   0xc   : > { %s3217_s30 = scalar_select %p287_p1, %s3107_s23, %s289_s28  }
   0xd   : > { %p3219_p5 = por %p300_p2, %p299_p0  ;;  %p3223_p6 = por %p306_p4, %p305_p3 }
   0xe   : > { %p2579_p7 = scmp.ge.s32.totalorder %s3111_s24, 1  ;;  %p364_p8 = scmp.lt.s32.totalorder %s3111_s24, 3 }
  0x10   : > { %p365_p9 = pnand %p2579_p7, %p364_p8 }
  0x11   : > { %p405_p10 = scmp.lt.s32.totalorder (!%p365_p9), %s3202_s25, 1  ;;  %s3695_s0 = sld [smem:[#allocation5_spill]] (!%p365_p9) }
  0x12   : > { %368 = sbr.rel (%p365_p9) target bundleno = 4662 (0x1236), region = 68  ;;  %s3696_s1 = sld [smem:[#allocation6_spill]] (!%p365_p9) }
  0x13   : > { %s3697_s2 = sld [smem:[#allocation7_spill]] (!%p365_p9)  ;;  %s2667_s20 = sshll.u32 (!%p365_p9), %s3202_s25, 7 }
  0x17   : > { %s406_s15 = scalar_select %p405_p10, %s3202_s25, 1  ;;  %vm410_vm0 = vcmask 261120   ;;  %v3113_v7 = vmov 0.0   ;;  %v444_v8 = vld [vmem:[%s3680_s3 + $0x18] sm:$0xff]  ;;  %v443_v10 = vld [vmem:[%s3680_s3 + $0x10] sm:$0xff]  ;;  %v442_v12 = vld [vmem:[%s3680_s3 + $0x8] sm:$0xff] }
  0x18   : > { %2768 = vmatprep.subr.mxu0 %v3113_v7  ;;  %2779 = vmatprep.subr.mxu1 %v3113_v7  ;;  %v2588_v9 = vld [vmem:[%s3680_s3 + $0x98] sm:$0xff]  ;;  %v2587_v11 = vld [vmem:[%s3680_s3 + $0x90] sm:$0xff]  ;;  %v2586_v13 = vld [vmem:[%s3680_s3 + $0x88] sm:$0xff]  ;;  %vm3114_vm1 = vmmov 0   ;;  %vm668_vm2 = vcmask 64512   ;;  %vm2427_vm3 = vcmask 523264  }
  0x19   : > { %s2581_s16 = sshll.u32 %s406_s15, 3  ;;  %2769 = vmatpush3.msra.mxu0 %v444_v8  ;;  %2780 = vmatpush3.msra.mxu1 %v2588_v9  ;;  %v441_v14 = vld [vmem:[%s3680_s3] sm:$0xff]  ;;  %v2593_v25 = vld [vmem:[%s3680_s3 + $0x118] sm:$0xff]  ;;  %v2592_v26 = vld [vmem:[%s3680_s3 + $0x110] sm:$0xff]  ;;  %s3115_s25 = smov [#allocation2]  }
  0x1a   : > { %s408_s19 = scalar_lea.vmem %s3695_s0, %s2581_s16  ;;  %2770 = vmatprep.subr.mxu0 %v3113_v7  ;;  %2781 = vmatprep.subr.mxu1 %v3113_v7  ;;  %v2585_v15 = vld [vmem:[%s3680_s3 + $0x80] sm:$0xff]  ;;  %v2591_v27 = vld [vmem:[%s3680_s3 + $0x108] sm:$0xff]  ;;  %v2601_v33 = vld [vmem:[%s3680_s3 + $0x38] sm:$0xff]  ;;  %s402_s16 = sand.u32 1, %s3103_s22  }
  0x1b   : > { %v3234_v0 = vld [vmem:[%s408_s19] sm:$0xff]  ;;  %2771 = vmatpush3.msra.mxu0 %v443_v10  ;;  %2782 = vmatpush3.msra.mxu1 %v2587_v11  ;;  %v2600_v34 = vld [vmem:[%s3680_s3 + $0x30] sm:$0xff]  ;;  %v2599_v35 = vld [vmem:[%s3680_s3 + $0x28] sm:$0xff]  ;;  %s2580_s17 = sshll.u32 %s402_s16, 3  ;;  %s2515_s0 = scalar_lea.hbm %s3689_s12, %s2667_s20 }
  0x1c   : > { %v411_v1 = vsel %vm410_vm0, %v3234_v0, 0.0  ;;  %2772 = vmatprep.subr.mxu0 %v3113_v7  ;;  %2783 = vmatprep.subr.mxu1 %v3113_v7  ;;  %v2582_v20 = vld [vmem:[%s3696_s1] ss:$0 sm:$0xff]  ;;  %v2611_v39 = vld [vmem:[%s3680_s3 + $0x138] sm:$0xff]  ;;  %v2610_v40 = vld [vmem:[%s3680_s3 + $0x130] sm:$0xff]  ;;  %s404_s26 = scalar_lea.vmem [#allocation2], %s2580_s17 }
  0x1d   : > { %412 = vadd.xlane.f32.xlu0 %v411_v1  ;;  %2773 = vmatpush3.msra.mxu0 %v442_v12  ;;  %v2583_v22 = vld [vmem:[%s3697_s2] ss:$0 sm:$0xff]  ;;  %v2609_v41 = vld [vmem:[%s3680_s3 + $0x128] sm:$0xff]  ;;  %v2606_v59 = vld [vmem:[%s3680_s3 + $0xb8] sm:$0xff]  ;;  %s2517_s28 = sshll.u32 %s404_s26, 4  ;;  %s2504_s1 = scalar_lea.sflag [#allocation3], %s402_s16  ;;  %s2518_s28 = int_to_ptr.vmem [resolvable:$true] %s2517_s28 }
  0x1e   : > { %2774 = vmatprep.subr.mxu0 %v3113_v7  ;;  %2784 = vmatpush3.msra.mxu1 %v2586_v13  ;;  %v2590_v28 = vld [vmem:[%s3680_s3 + $0x100] sm:$0xff]  ;;  %v2605_v60 = vld [vmem:[%s3680_s3 + $0xb0] sm:$0xff]  ;;  %v2604_v61 = vld [vmem:[%s3680_s3 + $0xa8] sm:$0xff]  ;;  %s3051_s2 = scalar_lea.vmem %s2518_s28, 128  ;;  %s3055_s17 = sshll.u32 %s3115_s25, 4  ;;  %s3056_s17 = int_to_ptr.vmem [resolvable:$false] %s3055_s17 }
  0x1f   : > { %2775 = vmatpush3.msra.mxu0 %v441_v14  ;;  %2785 = vmatprep.subr.mxu1 %v3113_v7  ;;  %v2598_v37 = vld [vmem:[%s3680_s3 + $0x20] sm:$0xff]  ;;  %v2616_v14 = vld [vmem:[%s3681_s4 + $0x8] sm:$0xff]  ;;  %p3052_p11 = scmp.ne.s32.totalorder %s2518_s28, %s3051_s2  ;;  %s3057_s18 = scalar_lea.vmem %s3056_s17, 256 }
  0x20   : > { %2776 = vmatprep.mubr.msk.f32.mxu0 %vm3114_vm1, %v3113_v7  ;;  %2786 = vmatpush3.msra.mxu1 %v2585_v15  ;;  %v2608_v42 = vld [vmem:[%s3680_s3 + $0x120] sm:$0xff]  ;;  %p3058_p0 = scmp.lt.s32.totalorder %s2518_s28, %s3056_s17  ;;  %p3059_p1 = scmp.lt.s32.totalorder %s3057_s18, %s3051_s2 }
  0x21   : > { %2787 = vmatprep.mubr.msk.f32.mxu1 %vm3114_vm1, %v3113_v7  ;;  %2790 = vmatprep.subr.mxu0 %v3113_v7  ;;  %v2603_v62 = vld [vmem:[%s3680_s3 + $0xa0] sm:$0xff]  ;;  %p3053_p12 = pnand %p3052_p11, %p3219_p5 }
  0x22   : > { %2806 = vmatprep.subr.mxu1 %v3113_v7  ;;  %p3060_p2 = por %p3059_p1, %p3058_p0 }
  0x23   : > { %p3054_p13 = pneg %p3053_p12 }
  0x25   : > { %p3061_p3 = pnand %p3060_p2, %p3054_p13 }
  0xa6   : > { %v413_v2 = vpop.xlane.xlu0 %412 }
  0xa7   : > { %v415_v3 = vmul.f32 0.03125, %v413_v2 }
  0xa9   : > { %v416_v4 = vsub.f32 %v3234_v0, %v415_v3 }
  0xab   : > { %v417_v5 = vmul.f32 %v416_v4, %v416_v4 }
  0xad   : > { %v418_v6 = vsel %vm410_vm0, %v417_v5, 0.0 }
  0xae   : > { %419 = vadd.xlane.f32.xlu0 %v418_v6 }
 0x137   : > { %v420_v16 = vpop.xlane.xlu0 %419 }
 0x138   : > { %v421_v17 = vmul.f32 0.03125, %v420_v16 }
 0x13a   : > { %v422_v18 = vadd.f32 1e-06, %v421_v17 }
 0x13c   : > { %3031 = vrsqrt.f32 %v422_v18  ;;  %v830_v18 = vld [vmem:[%s3681_s4] sm:$0xff] }
 0x149   : > { %v3032_v19 = vpop.eup %3031 }
 0x14a   : > { %v424_v21 = vmul.f32 %v3032_v19, %v416_v4  ;;  %v2627_v19 = vld [vmem:[%s3680_s3 + $0xd8] sm:$0xff] }
 0x14c   : > { %v432_v23 = vmul.f32 %v2582_v20, %v424_v21  ;;  %v2626_v20 = vld [vmem:[%s3680_s3 + $0xd0] sm:$0xff]  ;;  %v2625_v21 = vld [vmem:[%s3680_s3 + $0xc8] sm:$0xff] }
 0x14e   : > { %v3284_v24 = vadd.f32 %v2583_v22, %v432_v23  ;;  %v2624_v22 = vld [vmem:[%s3680_s3 + $0xc0] sm:$0xff]  ;;  %v2622_v23 = vld [vmem:[%s3680_s3 + $0x58] sm:$0xff] }
 0x150   : > { %2777 = vmatmul.mubr.msk.f32.vlgmr.msra.gmra.mxu0 %vm410_vm0, %v3284_v24  ;;  %2788 = vmatmul.mubr.msk.f32.vlgmr.msra.gmra.mxu1 %vm410_vm0, %v3284_v24 }
 0x151   : > { %2791 = vmatpush3.msra.mxu0 %v2593_v25  ;;  %2798 = vmatprep.mubr.msk.f32.mxu0 %vm3114_vm1, %v3113_v7 }
 0x152   : > { %2792 = vmatprep.subr.mxu0 %v3113_v7  ;;  %2808 = vmatprep.mubr.msk.f32.mxu1 %vm3114_vm1, %v3113_v7 }
 0x153   : > { %2793 = vmatpush3.msra.mxu0 %v2592_v26  ;;  %v2621_v26 = vld [vmem:[%s3680_s3 + $0x50] sm:$0xff] }
 0x154   : > { %2794 = vmatprep.subr.mxu0 %v3113_v7 }
 0x155   : > { %2795 = vmatpush3.msra.mxu0 %v2591_v27 }
 0x156   : > { %2796 = vmatprep.subr.mxu0 %v3113_v7 }
 0x157   : > { %2797 = vmatpush3.msra.mxu0 %v2590_v28  ;;  %v2620_v28 = vld [vmem:[%s3680_s3 + $0x48] sm:$0xff] }
 0x158   : > { %2799 = vmatmul.mubr.msk.f32.vlgmr.msra.gmra.mxu0 %vm410_vm0, %v3284_v24  ;;  %2801 = vmatprep.subr.mxu0 %v3113_v7 }
 0x159   : > { %2803 = vmatprep.mubr.msk.f32.mxu0 %vm3114_vm1, %v3113_v7 }
 0x210   : > { %v514_v29 = vpop.f32.mrf.mxu0  ;;  %v589_v30 = vpop.f32.mrf.mxu1 }
 0x211   : > { %2802 = vmatpush3.xpose.msk.msra.mxu0 %vm668_vm2, %v589_v30  ;;  %v2619_v30 = vld [vmem:[%s3680_s3 + $0x40] sm:$0xff] }
 0x212   : > { %v2778_v31 = vpop.f32.mrf.mxu0  ;;  %v2789_v32 = vpop.f32.mrf.mxu1  ;;  %2811 = vmatprep.subr.mxu0 %v3113_v7 }
 0x213   : > { %v2632_v32 = vld [vmem:[%s3680_s3 + $0x158] sm:$0xff] }
 0x214   : > { %2804 = vmatmul.mubr.msk.f32.vlgmr.msra.gmra.mxu0 %vm668_vm2, %v514_v29 }
 0x215   : > { %2812 = vmatpush3.msra.mxu0 %v2601_v33  ;;  %2819 = vmatprep.mubr.msk.f32.mxu0 %vm3114_vm1, %v3113_v7  ;;  %v2631_v33 = vld [vmem:[%s3680_s3 + $0x150] sm:$0xff] }
 0x216   : > { %2813 = vmatprep.subr.mxu0 %v3113_v7 }
 0x217   : > { %2814 = vmatpush3.msra.mxu0 %v2600_v34  ;;  %v2630_v34 = vld [vmem:[%s3680_s3 + $0x148] sm:$0xff] }
 0x218   : > { %v664_v36 = vpop.f32.mrf.mxu0  ;;  %2815 = vmatprep.subr.mxu0 %v3113_v7 }
 0x219   : > { %2807 = vmatpush3.msra.mxu1 %v664_v36  ;;  %2816 = vmatpush3.msra.mxu0 %v2599_v35  ;;  %v2629_v36 = vld [vmem:[%s3680_s3 + $0x140] sm:$0xff] }
 0x21a   : > { %v2800_v38 = vpop.f32.mrf.mxu0  ;;  %2817 = vmatprep.subr.mxu0 %v3113_v7  ;;  %2822 = vmatprep.subr.mxu1 %v3113_v7 }
 0x21b   : > { %2818 = vmatpush3.msra.mxu0 %v2598_v37 }
 0x21c   : > { %2820 = vmatmul.mubr.msk.f32.vlgmr.msra.gmra.mxu0 %vm410_vm0, %v3284_v24  ;;  %2833 = vmatprep.subr.mxu0 %v3113_v7 }
 0x21d   : > { %2834 = vmatpush3.msra.mxu0 %v2611_v39  ;;  %2841 = vmatprep.mubr.msk.f32.mxu0 %vm3114_vm1, %v3113_v7 }
 0x21e   : > { %2835 = vmatprep.subr.mxu0 %v3113_v7 }
 0x21f   : > { %2836 = vmatpush3.msra.mxu0 %v2610_v40 }
 0x220   : > { %2837 = vmatprep.subr.mxu0 %v3113_v7 }
 0x221   : > { %2838 = vmatpush3.msra.mxu0 %v2609_v41 }
 0x222   : > { %2839 = vmatprep.subr.mxu0 %v3113_v7 }
 0x223   : > { %2840 = vmatpush3.msra.mxu0 %v2608_v42 }
 0x224   : > { %2842 = vmatmul.mubr.msk.f32.vlgmr.msra.gmra.mxu0 %vm410_vm0, %v3284_v24  ;;  %2854 = vmatprep.subr.mxu0 %v3113_v7 }
 0x225   : > { %2856 = vmatprep.mubr.msk.f32.mxu0 %vm3114_vm1, %v3113_v7  ;;  %2855 = vmatpush3.msra.mxu0 %v2616_v14 }
 0x226   : > { %2864 = vmatprep.subr.mxu0 %v3113_v7 }
 0x2d4   : > { %v741_v43 = vpop.f32.mrf.mxu0 }
 0x2d5   : > { %v745_v44 = vmul.f32 0.35355338, %v741_v43 }
 0x2d6   : > { %v2805_v45 = vpop.f32.mrf.mxu0 }
 0x2d7   : > { %v746_v46 = vsel %vm668_vm2, %v745_v44, -inf }
 0x2d8   : > { %747 = vmax.xlane.f32.xlu1 %v746_v46 }
 0x2dc   : > { %v902_v47 = vpop.f32.mrf.mxu0 }
 0x2de   : > { %v2821_v48 = vpop.f32.mrf.mxu0 }
 0x2e4   : > { %v1052_v49 = vpop.f32.mrf.mxu0 }
 0x2e6   : > { %v2843_v50 = vpop.f32.mrf.mxu0 }
 0x361   : > { %v748_v51 = vpop.xlane.xlu1 %747 }
 0x362   : > { %v749_v52 = vsub.f32 %v745_v44, %v748_v51 }
 0x364   : > { %v750_v53 = vmul.f32 1.442695, %v749_v52 }
 0x366   : > { %3033 = vpow2.f32 %v750_v53  ;;  %v2637_v53 = vld [vmem:[%s3681_s4 + $0x10] sm:$0xff] }
 0x373   : > { %v3034_v54 = vpop.eup %3033 }
 0x374   : > { %v752_v55 = vsel %vm668_vm2, %v3034_v54, 0.0 }
 0x375   : > { %753 = vadd.xlane.f32.xlu1 %v752_v55 }
 0x3fe   : > { %v754_v56 = vpop.xlane.xlu1 %753 }
 0x3ff   : > { %3035 = vrcp.f32 %v754_v56 }
 0x40c   : > { %v3036_v57 = vpop.eup %3035 }
 0x40d   : > { %v756_v58 = vmul.f32 %v3036_v57, %v3034_v54  ;;  %v2642_v57 = vld [vmem:[%s3680_s3 + $0x78] sm:$0xff] }
 0x40f   : > { %2809 = vmatmul.mubr.msk.f32.vlgmr.msra.gmra.mxu1 %vm668_vm2, %v756_v58  ;;  %v2641_v58 = vld [vmem:[%s3680_s3 + $0x70] sm:$0xff] }
 0x410   : > { %2823 = vmatpush3.msra.mxu1 %v2606_v59  ;;  %2830 = vmatprep.mubr.msk.f32.mxu1 %vm3114_vm1, %v3113_v7  ;;  %v2640_v59 = vld [vmem:[%s3680_s3 + $0x68] sm:$0xff] }
 0x411   : > { %2824 = vmatprep.subr.mxu1 %v3113_v7 }
 0x412   : > { %2825 = vmatpush3.msra.mxu1 %v2605_v60  ;;  %v2639_v60 = vld [vmem:[%s3680_s3 + $0x60] sm:$0xff] }
 0x413   : > { %2826 = vmatprep.subr.mxu1 %v3113_v7 }
 0x414   : > { %2827 = vmatpush3.msra.mxu1 %v2604_v61  ;;  %v2652_v61 = vld [vmem:[%s3680_s3 + $0x178] sm:$0xff] }
 0x415   : > { %2828 = vmatprep.subr.mxu1 %v3113_v7 }
 0x416   : > { %2829 = vmatpush3.msra.mxu1 %v2603_v62  ;;  %v2651_v62 = vld [vmem:[%s3680_s3 + $0x170] sm:$0xff] }
 0x417   : > { %2831 = vmatmul.mubr.msk.f32.vlgmr.msra.gmra.mxu1 %vm410_vm0, %v3284_v24  ;;  %2844 = vmatprep.subr.mxu1 %v3113_v7 }
 0x418   : > { %2846 = vmatprep.mubr.msk.f32.mxu1 %vm3114_vm1, %v3113_v7 }
 0x4cf   : > { %v826_v63 = vpop.f32.mrf.mxu1 }
 0x4d1   : > { %v2810_v1 = vpop.f32.mrf.mxu1 }
 0x4d2   : > { %v2649_v1 = vld [vmem:[%s3680_s3 + $0x160] sm:$0xff] }
 0x4d7   : > { %v977_v2 = vpop.f32.mrf.mxu1 }
 0x4d8   : > { %2845 = vmatpush3.xpose.msk.msra.mxu1 %vm668_vm2, %v977_v2  ;;  %v2647_v2 = vld [vmem:[%s3680_s3 + $0xf8] sm:$0xff] }
 0x4d9   : > { %v2832_v3 = vpop.f32.mrf.mxu1  ;;  %2849 = vmatprep.subr.mxu1 %v3113_v7 }
 0x4db   : > { %2847 = vmatmul.mubr.msk.f32.vlgmr.msra.gmra.mxu1 %vm668_vm2, %v902_v47 }
 0x4dc   : > { %2850 = vmatpush3.msra.mxu1 %v1052_v49  ;;  %2851 = vmatprep.mubr.msk.f32.mxu1 %vm3114_vm1, %v3113_v7 }
 0x4dd   : > { %2859 = vmatprep.subr.mxu1 %v3113_v7 }
 0x59b   : > { %v1128_v4 = vpop.f32.mrf.mxu1 }
 0x59c   : > { %v1132_v5 = vmul.f32 0.35355338, %v1128_v4  ;;  %v2646_v4 = vld [vmem:[%s3680_s3 + $0xf0] sm:$0xff] }
 0x59d   : > { %v2848_v6 = vpop.f32.mrf.mxu1 }
 0x59e   : > { %v1133_v8 = vsel %vm668_vm2, %v1132_v5, -inf  ;;  %v2645_v6 = vld [vmem:[%s3680_s3 + $0xe8] sm:$0xff] }
 0x59f   : > { %1134 = vmax.xlane.f32.xlu0 %v1133_v8  ;;  %v2644_v8 = vld [vmem:[%s3680_s3 + $0xe0] sm:$0xff] }
 0x628   : > { %v1135_v9 = vpop.xlane.xlu0 %1134 }
 0x629   : > { %v1136_v10 = vsub.f32 %v1132_v5, %v1135_v9 }
 0x62b   : > { %v1137_v11 = vmul.f32 1.442695, %v1136_v10 }
 0x62d   : > { %3037 = vpow2.f32 %v1137_v11 }
 0x63a   : > { %v3038_v12 = vpop.eup %3037 }
 0x63b   : > { %v1139_v13 = vsel %vm668_vm2, %v3038_v12, 0.0 }
 0x63c   : > { %1140 = vadd.xlane.f32.xlu1 %v1139_v13 }
 0x6c5   : > { %v1141_v15 = vpop.xlane.xlu1 %1140 }
 0x6c6   : > { %3039 = vrcp.f32 %v1141_v15 }
 0x6d3   : > { %v3040_v16 = vpop.eup %3039 }
 0x6d4   : > { %v1143_v17 = vmul.f32 %v3040_v16, %v3038_v12 }
 0x6d6   : > { %2852 = vmatmul.mubr.msk.f32.vlgmr.msra.gmra.mxu1 %vm668_vm2, %v1143_v17 }
 0x6d7   : > { %2860 = vmatpush3.msra.mxu1 %v830_v18  ;;  %2861 = vmatprep.mubr.msk.f32.mxu1 %vm3114_vm1, %v3113_v7 }
 0x6d8   : > { %2875 = vmatprep.subr.mxu1 %v3113_v7 }
 0x6da   : > { %2862 = vmatmul.mubr.msk.f32.vlgmr.msra.gmra.mxu1 %vm668_vm2, %v826_v63  ;;  %v2650_v63 = vld [vmem:[%s3680_s3 + $0x168] sm:$0xff] }
 0x6db   : > { %2876 = vmatpush3.msra.mxu1 %v2627_v19  ;;  %2883 = vmatprep.mubr.msk.f32.mxu1 %vm3114_vm1, %v3113_v7 }
 0x6dc   : > { %2877 = vmatprep.subr.mxu1 %v3113_v7 }
 0x6dd   : > { %2878 = vmatpush3.msra.mxu1 %v2626_v20 }
 0x6de   : > { %2879 = vmatprep.subr.mxu1 %v3113_v7 }
 0x6df   : > { %2880 = vmatpush3.msra.mxu1 %v2625_v21 }
 0x6e0   : > { %2881 = vmatprep.subr.mxu1 %v3113_v7 }
 0x6e1   : > { %2882 = vmatpush3.msra.mxu1 %v2624_v22 }
 0x6e2   : > { %2884 = vmatmul.mubr.msk.f32.vlgmr.msra.gmra.mxu1 %vm410_vm0, %v3284_v24  ;;  %2897 = vmatprep.subr.mxu1 %v3113_v7 }
 0x6e3   : > { %2899 = vmatprep.mubr.msk.f32.mxu1 %vm3114_vm1, %v3113_v7 }
 0x796   : > { %v1213_v25 = vpop.f32.mrf.mxu1 }
 0x797   : > { %2857 = vmatmul.mubr.msk.f32.vlgmr.msra.gmra.mxu0 %vm668_vm2, %v1213_v25 }
 0x798   : > { %2865 = vmatpush3.msra.mxu0 %v2622_v23  ;;  %v2853_v27 = vpop.f32.mrf.mxu1  ;;  %2872 = vmatprep.mubr.msk.f32.mxu0 %vm3114_vm1, %v3113_v7 }
 0x799   : > { %2866 = vmatprep.subr.mxu0 %v3113_v7 }
 0x79a   : > { %2867 = vmatpush3.msra.mxu0 %v2621_v26  ;;  %v3440_v29 = vpop.f32.mrf.mxu1 }
 0x79b   : > { %2868 = vmatprep.subr.mxu0 %v3113_v7 }
 0x79c   : > { %2869 = vmatpush3.msra.mxu0 %v2620_v28  ;;  %v2863_v31 = vpop.f32.mrf.mxu1  ;;  %v2657_v28 = vld [vmem:[%s3681_s4 + $0x18] sm:$0xff] }
 0x79d   : > { %2870 = vmatprep.subr.mxu0 %v3113_v7 }
 0x79e   : > { %2871 = vmatpush3.msra.mxu0 %v2619_v30 }
 0x79f   : > { %2873 = vmatmul.mubr.msk.f32.vlgmr.msra.gmra.mxu0 %vm410_vm0, %v3284_v24  ;;  %2886 = vmatprep.subr.mxu0 %v3113_v7 }
 0x7a0   : > { %2887 = vmatpush3.msra.mxu0 %v2632_v32  ;;  %2894 = vmatprep.mubr.msk.f32.mxu0 %vm3114_vm1, %v3113_v7 }
 0x7a1   : > { %2888 = vmatprep.subr.mxu0 %v3113_v7 }
 0x7a2   : > { %v1511_v35 = vpop.f32.mrf.mxu1  ;;  %2889 = vmatpush3.msra.mxu0 %v2631_v33 }
 0x7a3   : > { %2890 = vmatprep.subr.mxu0 %v3113_v7  ;;  %2898 = vmatpush3.xpose.msk.msra.mxu1 %vm668_vm2, %v1511_v35  ;;  %v2659_v35 = vld [vmem:[%s3682_s5] ss:$0 sm:$0xff] }
 0x7a4   : > { %v2885_v37 = vpop.f32.mrf.mxu1  ;;  %2891 = vmatpush3.msra.mxu0 %v2630_v34  ;;  %2902 = vmatprep.subr.mxu1 %v3113_v7 }
 0x7a5   : > { %2892 = vmatprep.subr.mxu0 %v3113_v7 }
 0x7a6   : > { %2893 = vmatpush3.msra.mxu0 %v2629_v36 }
 0x7a7   : > { %2895 = vmatmul.mubr.msk.f32.vlgmr.msra.gmra.mxu0 %vm410_vm0, %v3284_v24  ;;  %2907 = vmatprep.subr.mxu0 %v3113_v7 }
 0x7a8   : > { %2909 = vmatprep.mubr.msk.f32.mxu0 %vm3114_vm1, %v3113_v7  ;;  %2908 = vmatpush3.msra.mxu0 %v2637_v53  ;;  %v2415_v53 = vld [vmem:[%s3687_s10 + $0x18] sm:$0xff] }
 0x7a9   : > { %2923 = vmatprep.subr.mxu0 %v3113_v7 }
 0x857   : > { %v3474_v38 = vpop.f32.mrf.mxu0 }
 0x858   : > { %v1362_v13 = vadd.f32 %v3440_v29, %v3474_v38 }
 0x859   : > { %v2858_v39 = vpop.f32.mrf.mxu0 }
 0x85f   : > { %v1436_v40 = vpop.f32.mrf.mxu0 }
 0x860   : > { %2900 = vmatmul.mubr.msk.f32.vlgmr.msra.gmra.mxu1 %vm668_vm2, %v1436_v40 }
 0x861   : > { %v2874_v41 = vpop.f32.mrf.mxu0  ;;  %2904 = vmatprep.mubr.msk.f32.mxu1 %vm3114_vm1, %v3113_v7 }
 0x867   : > { %v1586_v42 = vpop.f32.mrf.mxu0 }
 0x868   : > { %2903 = vmatpush3.msra.mxu1 %v1586_v42 }
 0x869   : > { %v2896_v43 = vpop.f32.mrf.mxu0  ;;  %2912 = vmatprep.subr.mxu1 %v3113_v7 }
 0x920   : > { %v1662_v44 = vpop.f32.mrf.mxu1 }
 0x921   : > { %v1666_v45 = vmul.f32 0.35355338, %v1662_v44 }
 0x922   : > { %v2901_v46 = vpop.f32.mrf.mxu1 }
 0x923   : > { %v1667_v47 = vsel %vm668_vm2, %v1666_v45, -inf  ;;  %v2330_v46 = vld [vmem:[%s3685_s8 + $0x18] sm:$0xff] }
 0x924   : > { %1668 = vmax.xlane.f32.xlu0 %v1667_v47  ;;  %v2328_v47 = vld [vmem:[%s3685_s8 + $0x8] sm:$0xff] }
 0x9ad   : > { %v1669_v48 = vpop.xlane.xlu0 %1668 }
 0x9ae   : > { %v1670_v49 = vsub.f32 %v1666_v45, %v1669_v48  ;;  %v2327_v48 = vld [vmem:[%s3685_s8] sm:$0xff] }
 0x9b0   : > { %v1671_v50 = vmul.f32 1.442695, %v1670_v49  ;;  %v2419_v49 = vld [vmem:[%s3687_s10 + $0x38] sm:$0xff] }
 0x9b2   : > { %3041 = vpow2.f32 %v1671_v50  ;;  %v2418_v50 = vld [vmem:[%s3687_s10 + $0x30] sm:$0xff] }
 0x9bf   : > { %v3042_v51 = vpop.eup %3041 }
 0x9c0   : > { %v1673_v52 = vsel %vm668_vm2, %v3042_v51, 0.0 }
 0x9c1   : > { %1674 = vadd.xlane.f32.xlu1 %v1673_v52  ;;  %v2416_v52 = vld [vmem:[%s3687_s10 + $0x20] sm:$0xff] }
 0xa4a   : > { %v1675_v54 = vpop.xlane.xlu1 %1674 }
 0xa4b   : > { %3043 = vrcp.f32 %v1675_v54 }
 0xa58   : > { %v3044_v55 = vpop.eup %3043 }
 0xa59   : > { %v1677_v56 = vmul.f32 %v3044_v55, %v3042_v51  ;;  %v2417_v51 = vld [vmem:[%s3687_s10 + $0x28] sm:$0xff] }
 0xa5b   : > { %2905 = vmatmul.mubr.msk.f32.vlgmr.msra.gmra.mxu1 %vm668_vm2, %v1677_v56 }
 0xa5c   : > { %2913 = vmatpush3.msra.mxu1 %v2642_v57  ;;  %2920 = vmatprep.mubr.msk.f32.mxu1 %vm3114_vm1, %v3113_v7 }
 0xa5d   : > { %2914 = vmatprep.subr.mxu1 %v3113_v7 }
 0xa5e   : > { %2915 = vmatpush3.msra.mxu1 %v2641_v58  ;;  %v2660_v58 = vld [vmem:[%s3683_s6] ss:$0 sm:$0xff] }
 0xa5f   : > { %2916 = vmatprep.subr.mxu1 %v3113_v7 }
 0xa60   : > { %2917 = vmatpush3.msra.mxu1 %v2640_v59 }
 0xa61   : > { %2918 = vmatprep.subr.mxu1 %v3113_v7 }
 0xa62   : > { %2919 = vmatpush3.msra.mxu1 %v2639_v60  ;;  %v2661_v60 = vld [vmem:[%s3684_s7] ss:$0 sm:$0xff] }
 0xa63   : > { %2921 = vmatmul.mubr.msk.f32.vlgmr.msra.gmra.mxu1 %vm410_vm0, %v3284_v24  ;;  %2934 = vmatprep.subr.mxu1 %v3113_v7 }
 0xa64   : > { %2935 = vmatpush3.msra.mxu1 %v2652_v61  ;;  %2942 = vmatprep.mubr.msk.f32.mxu1 %vm3114_vm1, %v3113_v7 }
 0xa65   : > { %2936 = vmatprep.subr.mxu1 %v3113_v7 }
 0xa66   : > { %2937 = vmatpush3.msra.mxu1 %v2651_v62 }
 0xa67   : > { %2938 = vmatprep.subr.mxu1 %v3113_v7 }
 0xa68   : > { %2939 = vmatpush3.msra.mxu1 %v2650_v63  ;;  %v2414_v63 = vld [vmem:[%s3687_s10 + $0x10] sm:$0xff] }
 0xa69   : > { %2940 = vmatprep.subr.mxu1 %v3113_v7 }
 0xa6a   : > { %2941 = vmatpush3.msra.mxu1 %v2649_v1  ;;  %v2413_v1 = vld [vmem:[%s3687_s10 + $0x8] sm:$0xff] }
 0xa6b   : > { %2943 = vmatmul.mubr.msk.f32.vlgmr.msra.gmra.mxu1 %vm410_vm0, %v3284_v24  ;;  %2955 = vmatprep.subr.mxu1 %v3113_v7 }
 0xa6c   : > { %2957 = vmatprep.mubr.msk.f32.mxu1 %vm3114_vm1, %v3113_v7  ;;  %2956 = vmatpush3.msra.mxu1 %v2657_v28 }
 0xa6d   : > { %2971 = vmatprep.subr.mxu1 %v3113_v7 }
 0xb1b   : > { %v1747_v3 = vpop.f32.mrf.mxu1 }
 0xb1c   : > { %2910 = vmatmul.mubr.msk.f32.vlgmr.msra.gmra.mxu0 %vm668_vm2, %v1747_v3  ;;  %v2662_v3 = vld [vmem:[%s3686_s9] ss:$0 sm:$0xff] }
 0xb1d   : > { %2924 = vmatpush3.msra.mxu0 %v2647_v2  ;;  %v2906_v5 = vpop.f32.mrf.mxu1  ;;  %2931 = vmatprep.mubr.msk.f32.mxu0 %vm3114_vm1, %v3113_v7  ;;  %v2412_v2 = vld [vmem:[%s3687_s10] sm:$0xff] }
 0xb1e   : > { %2925 = vmatprep.subr.mxu0 %v3113_v7 }
 0xb1f   : > { %2926 = vmatpush3.msra.mxu0 %v2646_v4 }
 0xb20   : > { %2927 = vmatprep.subr.mxu0 %v3113_v7 }
 0xb21   : > { %2928 = vmatpush3.msra.mxu0 %v2645_v6 }
 0xb22   : > { %2929 = vmatprep.subr.mxu0 %v3113_v7 }
 0xb23   : > { %v1898_v9 = vpop.f32.mrf.mxu1  ;;  %2930 = vmatpush3.msra.mxu0 %v2644_v8 }
 0xb24   : > { %2932 = vmatmul.mubr.msk.f32.vlgmr.msra.gmra.mxu0 %vm410_vm0, %v3284_v24  ;;  %2945 = vmatprep.subr.mxu0 %v3113_v7 }
 0xb25   : > { %v2922_v10 = vpop.f32.mrf.mxu1  ;;  %2947 = vmatprep.mubr.msk.f32.mxu0 %vm3114_vm1, %v3113_v7 }
 0xb2b   : > { %v2048_v11 = vpop.f32.mrf.mxu1 }
 0xb2d   : > { %v2944_v12 = vpop.f32.mrf.mxu1 }
 0xbdc   : > { %v1822_v14 = vpop.f32.mrf.mxu0 }
 0xbdd   : > { %v1826_v15 = vadd.f32 %v1822_v14, %v1362_v13 }
 0xbde   : > { %v2911_v16 = vpop.f32.mrf.mxu0 }
 0xbe4   : > { %v1973_v17 = vpop.f32.mrf.mxu0 }
 0xbe5   : > { %2946 = vmatpush3.xpose.msk.msra.mxu0 %vm668_vm2, %v1973_v17 }
 0xbe6   : > { %v2933_v18 = vpop.f32.mrf.mxu0  ;;  %2950 = vmatprep.subr.mxu0 %v3113_v7 }
 0xbe8   : > { %2948 = vmatmul.mubr.msk.f32.vlgmr.msra.gmra.mxu0 %vm668_vm2, %v1898_v9 }
 0xbe9   : > { %2951 = vmatpush3.msra.mxu0 %v2048_v11  ;;  %2952 = vmatprep.mubr.msk.f32.mxu0 %vm3114_vm1, %v3113_v7 }
 0xbea   : > { %2960 = vmatprep.subr.mxu0 %v3113_v7 }
 0xca8   : > { %v2124_v24 = vpop.f32.mrf.mxu0 }
 0xca9   : > { %v2128_v19 = vmul.f32 0.35355338, %v2124_v24 }
 0xcaa   : > { %v2949_v20 = vpop.f32.mrf.mxu0 }
 0xcab   : > { %v2129_v21 = vsel %vm668_vm2, %v2128_v19, -inf }
 0xcac   : > { %2130 = vmax.xlane.f32.xlu0 %v2129_v21 }
 0xd35   : > { %v2131_v22 = vpop.xlane.xlu0 %2130 }
 0xd36   : > { %v2132_v23 = vsub.f32 %v2128_v19, %v2131_v22 }
 0xd38   : > { %v2133_v25 = vmul.f32 1.442695, %v2132_v23 }
 0xd3a   : > { %3045 = vpow2.f32 %v2133_v25 }
 0xd47   : > { %v3046_v26 = vpop.eup %3045 }
 0xd48   : > { %v2135_v27 = vsel %vm668_vm2, %v3046_v26, 0.0 }
 0xd49   : > { %2136 = vadd.xlane.f32.xlu1 %v2135_v27 }
 0xdd2   : > { %v2137_v29 = vpop.xlane.xlu1 %2136 }
 0xdd3   : > { %3047 = vrcp.f32 %v2137_v29 }
 0xde0   : > { %v3048_v30 = vpop.eup %3047 }
 0xde1   : > { %v2139_v31 = vmul.f32 %v3048_v30, %v3046_v26 }
 0xde3   : > { %2953 = vmatmul.mubr.msk.f32.vlgmr.msra.gmra.mxu0 %vm668_vm2, %v2139_v31 }
 0xde4   : > { %2968 = vmatprep.mubr.msk.f32.mxu0 %vm3114_vm1, %v3113_v7  ;;  %2961 = vmatpush3.msra.mxu0 %v2330_v46 }
 0xde5   : > { %2962 = vmatprep.subr.mxu0 %v3113_v7 }
 0xea3   : > { %v2209_v32 = vpop.f32.mrf.mxu0 }
 0xea4   : > { %2958 = vmatmul.mubr.msk.f32.vlgmr.msra.gmra.mxu1 %vm668_vm2, %v2209_v32 }
 0xea5   : > { %v2954_v33 = vpop.f32.mrf.mxu0  ;;  %2987 = vmatprep.mubr.msk.f32.mxu1 %vm3114_vm1, %v3113_v7  ;;  %2972 = vmatpush3.msra.mxu1 %v2419_v49 }
 0xea6   : > { %2973 = vmatprep.subr.mxu1 %v3113_v7 }
 0xea7   : > { %2974 = vmatpush3.msra.mxu1 %v2418_v50 }
 0xea8   : > { %2975 = vmatprep.subr.mxu1 %v3113_v7 }
 0xea9   : > { %2976 = vmatpush3.msra.mxu1 %v2417_v51 }
 0xeaa   : > { %2977 = vmatprep.subr.mxu1 %v3113_v7 }
 0xeab   : > { %2978 = vmatpush3.msra.mxu1 %v2416_v52 }
 0xeac   : > { %2979 = vmatprep.subr.mxu1 %v3113_v7 }
 0xead   : > { %2980 = vmatpush3.msra.mxu1 %v2415_v53 }
 0xeae   : > { %2981 = vmatprep.subr.mxu1 %v3113_v7 }
 0xeaf   : > { %2982 = vmatpush3.msra.mxu1 %v2414_v63 }
 0xeb0   : > { %2983 = vmatprep.subr.mxu1 %v3113_v7 }
 0xeb1   : > { %2984 = vmatpush3.msra.mxu1 %v2413_v1 }
 0xeb2   : > { %2985 = vmatprep.subr.mxu1 %v3113_v7 }
 0xeb3   : > { %2986 = vmatpush3.msra.mxu1 %v2412_v2 }
 0xf64   : > { %v2284_v34 = vpop.f32.mrf.mxu1 }
 0xf65   : > { %v2288_v36 = vadd.f32 %v2284_v34, %v1826_v15 }
 0xf66   : > { %v2959_v37 = vpop.f32.mrf.mxu1 }
 0xf67   : > { %v2296_v38 = vadd.f32 %v2659_v35, %v2288_v36 }
 0xf69   : > { %v3576_v39 = vadd.f32 %v2296_v38, %v3234_v0  ;;  %v2329_v0 = vld [vmem:[%s3685_s8 + $0x10] sm:$0xff] }
 0xf6a   : > { %2963 = vmatpush3.msra.mxu0 %v2329_v0 }
 0xf6b   : > { %v2298_v40 = vsel %vm410_vm0, %v3576_v39, 0.0  ;;  %2964 = vmatprep.subr.mxu0 %v3113_v7 }
 0xf6c   : > { %2299 = vadd.xlane.f32.xlu0 %v2298_v40  ;;  %2965 = vmatpush3.msra.mxu0 %v2328_v47 }
 0xf6d   : > { %2966 = vmatprep.subr.mxu0 %v3113_v7  ;;  %v2664_v7 = vld [vmem:[%s3688_s11] ss:$0 sm:$0xff] }
 0xf6e   : > { %2967 = vmatpush3.msra.mxu0 %v2327_v48 }
 0xff5   : > { %v2300_v41 = vpop.xlane.xlu0 %2299 }
 0xff6   : > { %v2301_v42 = vmul.f32 0.03125, %v2300_v41 }
 0xff8   : > { %v2302_v43 = vsub.f32 %v3576_v39, %v2301_v42 }
 0xffa   : > { %v2303_v44 = vmul.f32 %v2302_v43, %v2302_v43 }
 0xffc   : > { %v2304_v45 = vsel %vm410_vm0, %v2303_v44, 0.0 }
 0xffd   : > { %2305 = vadd.xlane.f32.xlu1 %v2304_v45 }
0x1086   : > { %v2306_v54 = vpop.xlane.xlu1 %2305 }
0x1087   : > { %v2307_v55 = vmul.f32 0.03125, %v2306_v54 }
0x1089   : > { %v2308_v56 = vadd.f32 1e-06, %v2307_v55 }
0x108b   : > { %3049 = vrsqrt.f32 %v2308_v56 }
0x1098   : > { %v3050_v57 = vpop.eup %3049 }
0x1099   : > { %v2310_v59 = vmul.f32 %v3050_v57, %v2302_v43 }
0x109b   : > { %v2318_v61 = vmul.f32 %v2660_v58, %v2310_v59 }
0x109d   : > { %v2326_v62 = vadd.f32 %v2661_v60, %v2318_v61 }
0x109f   : > { %2969 = vmatmul.mubr.msk.f32.vlgmr.msra.gmra.mxu0 %vm410_vm0, %v2326_v62 }
0x115f   : > { %v2407_v4 = vpop.f32.mrf.mxu0 }
0x1160   : > { %v2408_v5 = vadd.f32 %v2662_v3, %v2407_v4 }
0x1161   : > { %v2970_v6 = vpop.f32.mrf.mxu0 }
0x1162   : > { %v2411_v8 = vmax.f32 %v2408_v5, 0.0 }
0x1164   : > { %2988 = vmatmul.mubr.msk.f32.vlgmr.msra.gmra.mxu1 %vm2427_vm3, %v2411_v8 }
0x1224   : > { %v2497_v9 = vpop.f32.mrf.mxu1 }
0x1225   : > { %v2498_v10 = vadd.f32 %v2664_v7, %v2497_v9 }
0x1226   : > { %v2989_v11 = vpop.f32.mrf.mxu1 }
0x1227   : > { %v2501_v12 = vadd.f32 %v2498_v10, %v3576_v39 }
0x1229   : > { %2502 = vst.msk [vmem:[%s404_s26] sm:$0xff] %vm410_vm0, %v2501_v12 }
0x122a   : > { %3064 = shalt.err (!%p3061_p3)
}
0x122b   : > { %s3065_s19 = scalar_lea.hbm %s2515_s0, 128  ;;  %s3069_s26 = scalar_lea.hbm %s3689_s12, 256 }
0x122c   : > { %p3066_p4 = scmp.ne.s32.totalorder %s2515_s0, %s3065_s19  ;;  %p3070_p9 = scmp.lt.s32.totalorder %s2515_s0, %s3689_s12 }
0x122d   : > { %p3071_p10 = scmp.lt.s32.totalorder %s3069_s26, %s3065_s19 }
0x122e   : > { %p3067_p7 = pnand %p3066_p4, %p3219_p5 }
0x122f   : > { %p3072_p11 = por %p3071_p10, %p3070_p9 }
0x1230   : > { %p3068_p8 = pneg %p3067_p7 }
0x1232   : > { %p3073_p12 = pnand %p3072_p11, %p3068_p8 }
0x1234   : > { %3076 = shalt.err (!%p3073_p12)
}
0x1235   : > { %2990 = dma.vmem_to_hbm [thread:$0]  (%p3219_p5), %s2518_s28, 128, %s2515_s0, %s2504_s1  }
0x1236 PF: > { %p2996_p13 = scmp.ge.s32.totalorder %s3111_s24, 2  ;;  %s2529_s2 = sand.u32 1, %s3099_s21  }
0x1237   : > { %s2530_s25 = scalar_lea.sflag [#allocation3], %s2529_s2 }
0x1238   : > { %p2993_p0 = pnand %p2996_p13, %p3223_p6 }
0x123a   : > { %p2994_p1 = pneg %p2993_p0 }
0x123c   : > { %3094 = dma.done.wait (%p2994_p1), %s2530_s25, 128  }
0x123d   : > { %3096 = vsyncadd (%p2994_p1), %s2530_s25, 4294967168  ;;  %p22_p2 = scmp.ge.s32.totalorder %s3206_s27, 4   ;;  %s3698_s21 = smov %s3103_s22 }
0x123e   : > { %s3699_s22 = smov %s3107_s23  ;;  %s3700_s23 = smov %s3217_s30 }
0x123f   : > { %s3701_s24 = smov %s3206_s27  ;;  %24 = sbr.rel (!%p22_p2) target bundleno = 7 (0x7), region = 117 }
0x1244   :  { %2535 = vsyncpa [#allocation3], 1 }
0x1245   :  { %2537 = vsyncpa [#allocation3 + $0x1], 1 }

</bundles_post_ra>
